<compile_context>
chip_gen: v7x
topology: tpu7x:2x2x1
jax: 0.10.0
libtpu: 0.0.40
codegen_flags: <defaults>
</compile_context>

<pallas_src>
import functools

import jax
import jax.numpy as jnp
from jax.experimental import pallas as pl
from jax.experimental.pallas import tpu as pltpu


def _log_transform_kernel(x_ref, o_ref, *, eps):
    x = x_ref[...]
    # Clamp in the input dtype (matches torch.clamp(min=eps), NaN propagates),
    # then take the log in f32 (EUP has slack; kernel is DMA-bound) and cast back.
    clamped = jnp.maximum(x, jnp.asarray(eps, dtype=x.dtype))
    o_ref[...] = jnp.log(clamped.astype(jnp.float32)).astype(o_ref.dtype)


def _round_up(n, m):
    return ((n + m - 1) // m) * m


def _vmem_budget():
    """(scoped-VMEM budget, per-block byte target). Works on v5e/v6e/v7x."""
    phys = None
    try:
        info = pltpu.get_tpu_info()
        phys = getattr(info, "vmem_capacity_bytes", None)
    except Exception:
        phys = None
    if not phys:
        phys = 64 * 1024 * 1024  # conservative default = smallest per-TC VMEM (v7x)
    # Leave headroom for compiler scratch; never ask for more than 48 MiB scoped.
    budget = min(int(phys) * 3 // 4, 48 * 1024 * 1024)
    block_bytes = budget // 4  # (input + output) x double-buffered
    return budget, block_bytes


def _launch(x2d, eps, *, donate=False):
    """Run the kernel on a (rows, width) slab. width is either a multiple of 128
    (lane-dense) or taken as the full last dim (masked-store fallback)."""
    rows, width = x2d.shape
    dtype = x2d.dtype
    itemsize = jnp.dtype(dtype).itemsize
    # Sublane multiple for the second-to-last block dim, by dtype width.
    sub = {4: 8, 2: 16, 1: 32}.get(itemsize, 8)

    budget, block_bytes = _vmem_budget()
    lane_dense = (width % 128 == 0)

    # ---- block width ----
    if not lane_dense or width * itemsize * sub <= block_bytes:
        block_width = width  # full width (legal: full-dim or multiple of 128)
    else:
        # Lane-dense but too wide for even a (sub, width) block: tile the lane axis.
        lanes = max(1, block_bytes // (sub * 128 * itemsize))
        block_width = min(width, lanes * 128)
    # TODO(synk): a non-lane-dense last dim so wide that a (sub, width) block
    # exceeds physical VMEM would need masked lane tiling; not handled here.

    # ---- block rows ----
    bytes_per_block_row = max(block_width * itemsize, 1)
    vmem_rows = max(sub, (block_bytes // bytes_per_block_row) // sub * sub)
    # Aim for >= 8 grid steps along rows (megacore sharding + pipelining) while
    # keeping blocks as large as the VMEM budget allows.
    rows_for_8 = _round_up(max(1, pl.cdiv(rows, 8)), sub)
    block_rows = min(vmem_rows, rows_for_8)
    if block_rows >= rows:
        # Whole row axis fits one block: split into >= 2 blocks when the sublane
        # granularity allows, so v7x's 2 TensorCores both get work.
        rows_for_2 = _round_up(max(1, pl.cdiv(rows, 2)), sub)
        block_rows = rows_for_2 if rows_for_2 < rows else rows

    grid = (pl.cdiv(rows, block_rows), pl.cdiv(width, block_width))

    # Explicit scoped-VMEM limit: at least what one pipelined step needs.
    need = 4 * block_rows * block_width * itemsize
    vmem_limit = int(max(budget, need + (2 << 20)))

    kernel = functools.partial(_log_transform_kernel, eps=eps)
    extra = {"input_output_aliases": {0: 0}} if donate else {}

    return pl.pallas_call(
        kernel,
        out_shape=jax.ShapeDtypeStruct((rows, width), dtype),
        grid=grid,
        in_specs=[pl.BlockSpec((block_rows, block_width), lambda i, j: (i, j))],
        out_specs=pl.BlockSpec((block_rows, block_width), lambda i, j: (i, j)),
        compiler_params=pltpu.CompilerParams(
            dimension_semantics=("parallel", "parallel"),
            vmem_limit_bytes=vmem_limit,
        ),
        **extra,
    )(x2d)


def log_transform(x, eps=1e-5, *, donate=False):
    """y = log(clamp(x, min=eps)) for N x (C) x T x F input; same shape/dtype."""
    orig_shape = x.shape
    if x.size == 0:
        return x
    if x.ndim == 0:
        return jnp.log(jnp.maximum(x, jnp.asarray(eps, x.dtype)))

    total = x.size
    last = orig_shape[-1]

    # Zero-copy 2-D views only — no pad/concat/slice of the full tensor.
    if x.ndim >= 2 and last % 128 == 0:
        x2d = x.reshape(-1, last)        # lane-dense, leading dims collapsed
    elif total % 128 == 0:
        x2d = x.reshape(-1, 128)         # lane-dense flat view (free reshape)
    elif x.ndim >= 2:
        x2d = x.reshape(-1, last)        # non-lane-dense: masked stores, no copies
    else:
        x2d = x.reshape(1, -1)

    y = _launch(x2d, eps, donate=donate)
    return y.reshape(orig_shape)


if __name__ == "__main__":
    key = jax.random.PRNGKey(0)

    # N x C x T x F, lane-dense last dim; values span negative / below-eps / positive.
    x = jax.random.normal(key, (2, 4, 16, 128), dtype=jnp.float32)
    y = jax.block_until_ready(log_transform(x, eps=1e-5))
    y_ref = jnp.log(jnp.maximum(x, 1e-5))
    assert y.shape == x.shape and y.dtype == x.dtype
    assert jnp.allclose(y, y_ref, atol=1e-6, rtol=1e-6)

    # 80 mel bins: last dim not lane-dense, but total % 128 == 0 -> (-1, 128) view.
    x2 = jax.random.uniform(
        jax.random.PRNGKey(1), (2, 4, 16, 80), dtype=jnp.float32, minval=-1.0, maxval=1.0
    )
    y2 = jax.block_until_ready(log_transform(x2, eps=1e-5))
    y2_ref = jnp.log(jnp.maximum(x2, 1e-5))
    assert y2.shape == x2.shape and y2.dtype == x2.dtype
    assert jnp.allclose(y2, y2_ref, atol=1e-6, rtol=1e-6)

    # Fully unaligned shape (total % 128 != 0) -> full-width masked-store path.
    x3 = jax.random.uniform(
        jax.random.PRNGKey(2), (3, 5, 7, 9), dtype=jnp.float32, minval=-1.0, maxval=1.0
    )
    y3 = jax.block_until_ready(log_transform(x3, eps=1e-5))
    y3_ref = jnp.log(jnp.maximum(x3, 1e-5))
    assert y3.shape == x3.shape and y3.dtype == x3.dtype
    assert jnp.allclose(y3, y3_ref, atol=1e-6, rtol=1e-6)

    # bf16 input: clamp in bf16 (torch semantics), log in f32 inside the kernel.
    xb = jax.random.normal(jax.random.PRNGKey(3), (2, 4, 16, 128)).astype(jnp.bfloat16)
    yb = jax.block_until_ready(log_transform(xb, eps=1e-5))
    yb_ref = jnp.log(
        jnp.maximum(xb, jnp.asarray(1e-5, jnp.bfloat16)).astype(jnp.float32)
    ).astype(jnp.bfloat16)
    assert yb.shape == xb.shape and yb.dtype == xb.dtype
    assert jnp.allclose(
        yb.astype(jnp.float32), yb_ref.astype(jnp.float32), atol=2e-2, rtol=2e-2
    )

    print("KERNEL_OK")
</pallas_src>

<mosaic_0001>
module attributes {stable_mosaic.version = 11 : i64} {
  func.func @_log_transform_kernel(%arg0: i32, %arg1: i32, %arg2: memref<16x128xf32, #tpu.memory_space<vmem>>, %arg3: memref<16x128xf32, #tpu.memory_space<vmem>>) attributes {dimension_semantics = [#tpu.dimension_semantics<parallel>, #tpu.dimension_semantics<parallel>], iteration_bounds = array<i64: 8, 1>, scalar_prefetch = 0 : i64, scratch_operands = 0 : i64, tpu.core_type = #tpu.core_type<tc>, window_params = [{transform_indices = @transform_0, window_bounds = array<i64: 16, 128>}, {transform_indices = @transform_1, window_bounds = array<i64: 16, 128>}]} {
    %c0 = arith.constant 0 : index
    %c0_0 = arith.constant 0 : index
    %0 = vector.load %arg2[%c0, %c0_0] : memref<16x128xf32, #tpu.memory_space<vmem>>, vector<16x128xf32>
    %cst = arith.constant 9.99999974E-6 : f32
    %1 = vector.broadcast %cst : f32 to vector<16x128xf32>
    %2 = arith.maximumf %0, %1 : vector<16x128xf32>
    %3 = math.log %2 : vector<16x128xf32>
    %c0_1 = arith.constant 0 : index
    %c0_2 = arith.constant 0 : index
    %4 = vector.load %arg3[%c0_1, %c0_2] : memref<16x128xf32, #tpu.memory_space<vmem>>, vector<16x128xf32>
    tpu.vector_store %arg3[%c0_1, %c0_2], %3 {strides = array<i32>} : memref<16x128xf32, #tpu.memory_space<vmem>>, vector<16x128xf32>,
    return
  }
  func.func @transform_0(%arg0: i32, %arg1: i32) -> (i32, i32) {
    %c0_i32 = arith.constant 0 : i32
    return %arg0, %arg1 : i32, i32
  }
  func.func @transform_1(%arg0: i32, %arg1: i32) -> (i32, i32) {
    %c0_i32 = arith.constant 0 : i32
    return %arg0, %arg1 : i32, i32
  }
}

</mosaic_0001>

<bundles_post_ra>
// kernel: tpu_custom_call.1
= control target key start
LH: loop header
LB: loop body
LE: loop exit
PB: predicated region body
PF: predicated region fallthrough
CT: control target
= control target key end

     0   :  { %6 = vsyncpa [#allocation3], 0  ;;  %s654_s0 = inlined_call_operand.hbm [shape: f32[128,128], index: 0, kind: input, shape index: {}]   ;;  %s655_s1 = inlined_call_operand.hbm [shape: f32[128,128], index: 1, kind: output, shape index: {}]  }
   0x1   :  { %8 = vsyncpa [#allocation3 + $0x1], 0 }
   0x2   :  { %9 = vsyncpa [#allocation4], 0 }
   0x3   :  { %11 = vsyncpa [#allocation4 + $0x1], 0  ;;  %s481_s6 = smov 0   ;;  %s483_s7 = smov 0  }
   0x4   :  { %s485_s8 = smov 0   ;;  %s487_s9 = smov 0  }
   0x5   :  { %s489_s10 = smov 0   ;;  %s491_s11 = smov 0  }
   0x6 LB: > { %s264_s12 = sadd.s32 4294967295, %s463_s11   ;;  %s265_s13 = sadd.s32 4294967294, %s463_s11   ;;  %s463_s11 = sphi %s491_s11, %s17_s11   ;;  %s459_s10 = sphi %s489_s10, %s669_s10   ;;  %s455_s9 = sphi %s487_s9, %s668_s9   ;;  %s451_s8 = sphi %s485_s8, %s667_s8   ;;  %s447_s7 = sphi %s483_s7, %s666_s7   ;;  %s443_s6 = sphi %s481_s6, %s665_s6  }
   0x7   : > { %s29_s14 = sadd.s32 1, %s459_s10  ;;  %s38_s15 = sadd.s32 1, %s451_s8 }
   0x8   : > { %p31_p0 = scmp.ge.s32.totalorder %s29_s14, 8  ;;  %p45_p1 = scmp.ne.s32.totalorder %s451_s8, %s447_s7 }
   0x9   : > { %p46_p2 = scmp.eq.s32.totalorder %s463_s11, 0  ;;  %p51_p3 = scmp.ne.s32.totalorder %s447_s7, %s443_s6 }
   0xa   : > { %s671_s14 = smov (%p31_p0, %s29_s14), 0  ;;  %p52_p5 = scmp.eq.s32.totalorder %s264_s12, 0 }
   0xb   : > { %p522_p4 = por %p46_p2, %p45_p1  ;;  %s33_s17 = ssub.s32 %s459_s10, %s671_s14 }
   0xc   : > { %p77_p6 = scmp.eq.s32.totalorder %s264_s12, 7  ;;  %p36_p7 = scmp.eq.s32.totalorder %s33_s17, 0 }
   0xd   : > { %p528_p8 = por %p52_p5, %p51_p3  ;;  %p83_p10 = scmp.eq.s32.totalorder %s265_s13, 7 }
   0xe   : > { %p532_p9 = por %p77_p6, %p45_p1  ;;  %p293_p12 = scmp.lt.s32.totalorder %s463_s11, 8 }
   0xf   : > { %s537_s20 = scalar_select %p36_p7, %s451_s8, %s38_s15  }
  0x10   : > { %s659_s19 = scalar_select %p532_p9, 1, 0 }
  0x11   : > { %p539_p11 = por %p83_p10, %p51_p3  ;;  %s103_s22 = sand.u32 1, %s451_s8  }
  0x12   : > { %s268_s23 = sshll.u32 %s103_s22, 4  ;;  %s279_s24 = sshll.u32 %s459_s10, 8 }
  0x13   : > { %s660_s21 = scalar_select %p539_p11, 1, 0 }
  0x14   : > { %s549_s27 = scalar_lea.hbm %s654_s0, %s279_s24  ;;  %s107_s28 = scalar_lea.vmem [#allocation2], %s268_s23 }
  0x15   : > { %s115_s29 = sshll.u32 %s107_s28, 4  ;;  %p555_p13 = pnand %p293_p12, %p522_p4  ;;  %s551_s29 = int_to_ptr.vmem [resolvable:$true] %s115_s29 }
  0x16   : > { %s560_s2 = scalar_lea.sflag [#allocation3], %s103_s22  ;;  %s351_s3 = scalar_lea.hbm %s549_s27, 256 }
  0x17   : > { %p352_p1 = scmp.ne.s32.totalorder %s549_s27, %s351_s3  ;;  %p353_p2 = pneg %p555_p13 }
  0x18   : > { %s356_s12 = scalar_lea.hbm %s654_s0, 2048  ;;  %p357_p4 = scmp.lt.u32.totalorder %s549_s27, %s654_s0 }
  0x19   : > { %p354_p3 = pnand %p353_p2, %p352_p1  ;;  %p358_p6 = scmp.lt.u32.totalorder %s356_s12, %s351_s3 }
  0x1a   : > { %p360_p10 = scmp.lt.u32.totalorder %s351_s3, %s549_s27 }
  0x1b   : > { %p355_p5 = pneg %p354_p3  ;;  %p359_p7 = por %p358_p6, %p357_p4 }
  0x1d   : > { %p361_p12 = por %p360_p10, %p359_p7 }
  0x1f   : > { %p362_p0 = pnand %p361_p12, %p355_p5 }
  0x21   : > { %365 = shalt.err (!%p362_p0)
}
  0x22   : > { %s366_s16 = scalar_lea.vmem %s551_s29, 256  ;;  %s465_s17 = smov [#allocation2]  }
  0x23   : > { %p367_p1 = scmp.ne.s32.totalorder %s551_s29, %s366_s16  ;;  %s371_s22 = sshll.u32 %s465_s17, 4  ;;  %s372_s22 = int_to_ptr.vmem [resolvable:$false] %s371_s22 }
  0x24   : > { %s373_s23 = scalar_lea.vmem %s372_s22, 512  ;;  %p374_p9 = scmp.lt.s32.totalorder %s551_s29, %s372_s22 }
  0x25   : > { %p369_p3 = pnand %p367_p1, %p353_p2  ;;  %p375_p4 = scmp.lt.s32.totalorder %s373_s23, %s366_s16 }
  0x27   : > { %p370_p11 = pneg %p369_p3  ;;  %p376_p6 = por %p375_p4, %p374_p9 }
  0x29   : > { %p377_p7 = pnand %p376_p6, %p370_p11 }
  0x2b   : > { %380 = shalt.err (!%p377_p7)
}
  0x2c   : > { %s466_s24 = smov 128   ;;  %s467_s25 = smov 8  }
  0x2d   : > { %288 = dma.hbm_to_vmem [thread:$0]  (!%p555_p13), %s549_s27, 256, %s551_s29, %s560_s2, %s466_s24, %s466_s24, %s467_s25  }
  0x2e   : > { %p123_p0 = scmp.lt.s32.totalorder %s463_s11, 9  ;;  %p662_p2 = scmp.ge.s32.totalorder %s463_s11, 1 }
  0x30   : > { %p124_p5 = pnand %p662_p2, %p123_p0 }
  0x31   : > { %s592_s26 = sand.u32 (!%p124_p5), 1, %s447_s7  }
  0x32   : > { %127 = sbr.rel (%p124_p5) target bundleno = 90 (0x5a), region = 24  ;;  %s272_s28 = sshll.u32 (!%p124_p5), %s592_s26, 4 }
  0x33   : > { %s130_s3 = scalar_lea.sflag (!%p124_p5), [#allocation3], %s592_s26  ;;  %s133_s4 = scalar_lea.vmem (!%p124_p5), [#allocation2], %s272_s28 }
  0x39   : > { %434 = dma.done.wait (%p528_p8), %s130_s3, 256  }
  0x3a   : > { %436 = vsyncadd (%p528_p8), %s130_s3, 4294967040  ;;  %v154_v0 = vld [vmem:[%s133_s4] sm:$0xff]  ;;  %v155_v1 = vld [vmem:[%s133_s4 + $0x8] sm:$0xff]  ;;  %s151_s27 = scalar_lea.vmem [#allocation5], %s272_s28  ;;  %s280_s30 = sshll.u32 %s455_s9, 8 }
  0x3b   : > { %v156_v2 = vmax.f32 %v154_v0, 1e-05  ;;  %v157_v3 = vmax.f32 %v155_v1, 1e-05  ;;  %s179_s29 = sshll.u32 %s151_s27, 4  ;;  %s606_s5 = scalar_lea.hbm %s655_s1, %s280_s30  ;;  %s601_s29 = int_to_ptr.vmem [resolvable:$true] %s179_s29 }
  0x3c   : > { %s165_s12 = scalar_lea.sflag [#allocation4], %s592_s26  ;;  %s381_s13 = scalar_lea.vmem %s601_s29, 256 }
  0x3d   : > { %347 = vlog2.f32 %v156_v2  ;;  %p382_p8 = scmp.ne.s32.totalorder %s601_s29, %s381_s13  ;;  %p663_p9 = scmp.ne.s32.totalorder %s659_s19, 0 }
  0x3e   : > { %349 = vlog2.f32 %v157_v3  ;;  %s468_s9 = smov [#allocation5]  }
  0x3f   : > { %p383_p11 = pnand %p382_p8, %p663_p9  ;;  %s385_s15 = sshll.u32 %s468_s9, 4  ;;  %s386_s15 = int_to_ptr.vmem [resolvable:$false] %s385_s15 }
  0x40   : > { %s387_s16 = scalar_lea.vmem %s386_s15, 512  ;;  %p388_p10 = scmp.lt.s32.totalorder %s601_s29, %s386_s15 }
  0x41   : > { %p384_p13 = pneg %p383_p11  ;;  %p389_p12 = scmp.lt.s32.totalorder %s387_s16, %s381_s13 }
  0x43   : > { %p390_p1 = por %p389_p12, %p388_p10 }
  0x45   : > { %p391_p3 = pnand %p390_p1, %p384_p13 }
  0x47   : > { %v348_v4 = vpop.eup %347 }
  0x48   : > { %v350_v5 = vpop.eup %349  ;;  %v159_v6 = vmul.f32 0.6931472, %v348_v4 }
  0x49   : > { %v161_v7 = vmul.f32 0.6931472, %v350_v5 }
  0x4a   : > { %162 = vst [vmem:[%s151_s27] sm:$0xff] %v159_v6 }
  0x4b   : > { %163 = vst [vmem:[%s151_s27 + $0x8] sm:$0xff] %v161_v7 }
  0x4c   : > { %394 = shalt.err (!%p391_p3)
}
  0x4d   : > { %s395_s17 = scalar_lea.hbm %s606_s5, 256  ;;  %s399_s24 = scalar_lea.hbm %s655_s1, 2048 }
  0x4e   : > { %p396_p4 = scmp.ne.s32.totalorder %s606_s5, %s395_s17  ;;  %p400_p0 = scmp.lt.u32.totalorder %s606_s5, %s655_s1 }
  0x4f   : > { %p401_p2 = scmp.lt.u32.totalorder %s399_s24, %s395_s17  ;;  %p403_p8 = scmp.lt.u32.totalorder %s395_s17, %s606_s5 }
  0x50   : > { %p397_p6 = pnand %p396_p4, %p663_p9 }
  0x51   : > { %p402_p5 = por %p401_p2, %p400_p0 }
  0x52   : > { %p398_p7 = pneg %p397_p6 }
  0x53   : > { %p404_p11 = por %p403_p8, %p402_p5 }
  0x55   : > { %p405_p13 = pnand %p404_p11, %p398_p7 }
  0x57   : > { %408 = shalt.err (!%p405_p13)
}
  0x58   : > { %s469_s3 = smov 128   ;;  %s470_s4 = smov 8  }
  0x59   : > { %283 = dma.vmem_to_hbm [thread:$0]  (%p663_p9), %s601_s29, 256, %s606_s5, %s165_s12, %s469_s3, %s469_s3, %s470_s4  }
  0x5a PF: > { %p294_p10 = scmp.ge.s32.totalorder %s463_s11, 2  ;;  %s194_s27 = sand.u32 1, %s443_s6  }
  0x5b   : > { %p664_p12 = scmp.ne.s32.totalorder %s660_s21, 0  ;;  %s195_s30 = scalar_lea.sflag [#allocation4], %s194_s27 }
  0x5d   : > { %p290_p1 = pnand %p294_p10, %p664_p12 }
  0x5f   : > { %438 = dma.done.wait (!%p290_p1), %s195_s30, 256  }
  0x60   : > { %440 = vsyncadd (!%p290_p1), %s195_s30, 4294967040  ;;  %s17_s11 = sadd.s32 1, %s463_s11   ;;  %s665_s6 = smov %s447_s7 }
  0x61   : > { %p14_p3 = scmp.ge.s32.totalorder %s17_s11, 10   ;;  %s666_s7 = smov %s451_s8 }
  0x62   : > { %s667_s8 = smov %s537_s20  ;;  %s668_s9 = smov %s459_s10 }
  0x63   : > { %s669_s10 = smov %s671_s14  ;;  %16 = sbr.rel (!%p14_p3) target bundleno = 6 (0x6), region = 69 }
  0x6a   :  { %200 = vsyncpa [#allocation3], 1 }
  0x6b   :  { %202 = vsyncpa [#allocation3 + $0x1], 1 }
  0x6c   :  { %203 = vsyncpa [#allocation4], 1 }
  0x6d   :  { %205 = vsyncpa [#allocation4 + $0x1], 1 }

</bundles_post_ra>
